<compile_context>
chip_gen: v7x
topology: tpu7x:2x2x1
jax: 0.10.0
libtpu: 0.0.40
codegen_flags: <defaults>
</compile_context>

<pallas_src>
import jax
import jax.numpy as jnp
from jax.experimental import pallas as pl
from jax.experimental.pallas import tpu as pltpu


def _round_up(x, m):
    return ((x + m - 1) // m) * m


def _vmem_budget_and_limit_cap():
    """Per-generation VMEM budgeting.

    v5e / v6e: 128 MiB physical per TensorCore -> allow up to ~100 MiB.
    v7x:        64 MiB physical per TensorCore -> cap at ~52 MiB.
    """
    physical = 64 << 20  # conservative default if the query fails
    try:
        cap = getattr(pltpu.get_tpu_info(), "vmem_capacity_bytes", None)
        if cap:
            physical = int(cap)
    except Exception:
        pass
    if physical >= (96 << 20):
        limit_cap = 100 << 20
    else:
        limit_cap = max(physical - (12 << 20), 32 << 20)
    budget = limit_cap - (8 << 20)  # tile-selection budget with extra headroom
    return budget, limit_cap


def _auto_tiles(B, INp, HIDp, OUTp, x_isz, w_isz, o_isz, budget, row_align):
    """Pick (tile_m, tile_k).  Weights resident if they fit; otherwise stream
    the hidden dim with a modest tile_k and spend the budget on tile_m."""
    # ---- hidden (reduction) tile -------------------------------------------
    w_total = (INp * HIDp + HIDp * OUTp) * w_isz
    if w_total <= (budget * 6) // 10:
        tile_k = HIDp  # fully resident, grid_k == 1
    else:
        tile_k = 128   # HIDp is a multiple of 128 by construction
        for cand in (512, 256):
            if HIDp % cand == 0 and 2 * (INp + OUTp) * cand * w_isz <= (budget * 4) // 10:
                tile_k = cand
                break
        # TODO(synk): if even 128-wide double-buffered weight chunks overflow
        # the budget (huge IN+OUT), IN/OUT would need tiling too.
    grid_k = HIDp // tile_k
    w_bufs = 1 if grid_k == 1 else 2
    weight_bytes = w_bufs * (INp * tile_k + tile_k * OUTp) * w_isz

    # ---- batch tile ---------------------------------------------------------
    per_row = (2 * INp * x_isz        # x tile (double-buffered)
               + 2 * OUTp * o_isz     # out tile (double-buffered)
               + OUTp * 4             # possible f32 accumulator
               + tile_k * 4)          # f32 hidden intermediate h
    avail = max(budget - weight_bytes, 4 << 20)
    h_rows_cap = max((4 << 20) // (tile_k * 4), row_align)  # cap h at ~4 MiB
    tile_m = min(avail // per_row, h_rows_cap, 1024)
    tile_m = max((tile_m // row_align) * row_align, row_align)

    bp_min = _round_up(B, row_align)
    tile_m = min(tile_m, bp_min)
    # Resident weights: prefer >=2 batch tiles (pipeline overlap; feeds both
    # v7x TensorCores through the "parallel" axis).  Weights are fetched once
    # either way, so the split costs no extra HBM traffic.
    if grid_k == 1 and tile_m >= bp_min and B >= 2 * row_align:
        tile_m = min(tile_m, _round_up(-(-B // 2), row_align))
    return tile_m, tile_k


# ---------------------------------------------------------------------------
# Kernels
# ---------------------------------------------------------------------------
def _mlp_kernel_resident(x_ref, w1_ref, w2_ref, o_ref):
    """grid_k == 1 fast path: weights fully resident, no accumulation state."""
    xv = x_ref[...].astype(w1_ref.dtype)
    h = jnp.maximum(
        jnp.dot(xv, w1_ref[...], preferred_element_type=jnp.float32), 0.0)
    o_ref[...] = jnp.dot(h.astype(w2_ref.dtype), w2_ref[...],
                         preferred_element_type=jnp.float32).astype(o_ref.dtype)


def _mlp_kernel_stream_inplace(x_ref, w1_ref, w2_ref, o_ref):
    """Streamed hidden dim; f32 output block doubles as the accumulator."""
    k = pl.program_id(1)
    xv = x_ref[...].astype(w1_ref.dtype)
    h = jnp.maximum(
        jnp.dot(xv, w1_ref[...], preferred_element_type=jnp.float32), 0.0)
    p = jnp.dot(h.astype(w2_ref.dtype), w2_ref[...],
                preferred_element_type=jnp.float32)

    @pl.when(k == 0)
    def _():
        o_ref[...] = p

    @pl.when(k > 0)
    def _():
        o_ref[...] += p


def _mlp_kernel_stream_acc(x_ref, w1_ref, w2_ref, o_ref, acc_ref):
    """Streamed hidden dim; narrow output dtype needs an f32 scratch."""
    k = pl.program_id(1)

    @pl.when(k == 0)
    def _():
        acc_ref[...] = jnp.zeros_like(acc_ref)

    xv = x_ref[...].astype(w1_ref.dtype)
    h = jnp.maximum(
        jnp.dot(xv, w1_ref[...], preferred_element_type=jnp.float32), 0.0)
    acc_ref[...] += jnp.dot(h.astype(w2_ref.dtype), w2_ref[...],
                            preferred_element_type=jnp.float32)

    @pl.when(k == pl.num_programs(1) - 1)
    def _():
        o_ref[...] = acc_ref[...].astype(o_ref.dtype)


# ---------------------------------------------------------------------------
# Wrapper
# ---------------------------------------------------------------------------
def two_layer_mlp(x, w1, w2, *, tile_m=None, tile_k=None):
    """out = relu(x @ w1) @ w2, fused in a single Pallas TPU kernel.

    Weights are consumed in their stored dtype (cast them once at model load
    for the bf16 MXU path); x is cast to the weight dtype inside the kernel,
    accumulation is f32, output dtype matches x.
    """
    B, IN = x.shape
    IN2, HID = w1.shape
    HID2, OUT = w2.shape
    assert IN == IN2 and HID == HID2, "weight shapes must chain with the input"

    out_dtype = x.dtype
    x_isz = jnp.dtype(x.dtype).itemsize
    w_isz = jnp.dtype(w1.dtype).itemsize
    o_isz = jnp.dtype(out_dtype).itemsize
    row_align = 8 if x_isz >= 4 else (16 if x_isz == 2 else 32)

    # Lane-dense shapes: pad IN/HID/OUT to multiples of 128.  Zero padding is
    # exact here (no bias): zero x cols / W1 rows add nothing, zero W1 cols
    # give relu(0)=0, zero W2 rows/cols add nothing.  For production shapes
    # these are already aligned (pads become no-ops); ideally pad the weights
    # once at model load, not per call.
    INp, HIDp, OUTp = (_round_up(d, 128) for d in (IN, HID, OUT))
    if INp != IN:
        x = jnp.pad(x, ((0, 0), (0, INp - IN)))
    if (INp, HIDp) != (IN, HID):
        w1 = jnp.pad(w1, ((0, INp - IN), (0, HIDp - HID)))
    if (HIDp, OUTp) != (HID, OUT):
        w2 = jnp.pad(w2, ((0, HIDp - HID), (0, OUTp - OUT)))

    budget, limit_cap = _vmem_budget_and_limit_cap()
    auto_tm, auto_tk = _auto_tiles(B, INp, HIDp, OUTp, x_isz, w_isz, o_isz,
                                   budget, row_align)
    tk = auto_tk if tile_k is None else int(tile_k)
    assert HIDp % tk == 0 and tk % 128 == 0, \
        "tile_k must be a 128-multiple divisor of the padded hidden dim"
    tm = auto_tm if tile_m is None else int(tile_m)
    tm = max(row_align, (tm // row_align) * row_align)

    grid_k = HIDp // tk
    w_bufs = 1 if grid_k == 1 else 2
    weight_bytes = w_bufs * (INp * tk + tk * OUTp) * w_isz
    use_acc = (grid_k > 1) and (out_dtype != jnp.float32)
    per_row = 2 * INp * x_isz + 2 * OUTp * o_isz + tk * 4
    if use_acc:
        per_row += OUTp * 4
    footprint = weight_bytes + tm * per_row
    vmem_limit = int(min(max(footprint + (6 << 20), 32 << 20), limit_cap))

    # Zero-pad ragged batches to the tile (zero rows -> zero outputs).
    Bp = _round_up(B, tm)
    if Bp != B:
        x = jnp.pad(x, ((0, Bp - B), (0, 0)))
    grid_m = Bp // tm

    w_passes = grid_m if grid_k > 1 else 1   # weight re-streaming per batch tile
    cost = pl.CostEstimate(
        flops=2 * Bp * INp * HIDp + 2 * Bp * HIDp * OUTp,
        transcendentals=0,
        bytes_accessed=(Bp * INp * x_isz
                        + w_passes * (INp * HIDp + HIDp * OUTp) * w_isz
                        + Bp * OUTp * o_isz),
    )

    if grid_k == 1:
        # Fast path: resident, single-buffered weights; 1-D parallel batch grid.
        out = pl.pallas_call(
            _mlp_kernel_resident,
            out_shape=jax.ShapeDtypeStruct((Bp, OUTp), out_dtype),
            grid_spec=pltpu.PrefetchScalarGridSpec(
                num_scalar_prefetch=0,
                grid=(grid_m,),
                in_specs=[
                    pl.BlockSpec((tm, INp), lambda i: (i, 0)),
                    pl.BlockSpec((INp, HIDp), lambda i: (0, 0),
                                 pipeline_mode=pl.Buffered(1)),
                    pl.BlockSpec((HIDp, OUTp), lambda i: (0, 0),
                                 pipeline_mode=pl.Buffered(1)),
                ],
                out_specs=pl.BlockSpec((tm, OUTp), lambda i: (i, 0)),
            ),
            compiler_params=pltpu.CompilerParams(
                dimension_semantics=("parallel",),
                vmem_limit_bytes=vmem_limit),
            cost_estimate=cost,
        )(x, w1, w2)
    else:
        in_specs = [
            pl.BlockSpec((tm, INp), lambda i, k: (i, 0)),
            pl.BlockSpec((INp, tk), lambda i, k: (0, k)),
            pl.BlockSpec((tk, OUTp), lambda i, k: (k, 0)),
        ]
        out_spec = pl.BlockSpec((tm, OUTp), lambda i, k: (i, 0))
        kernel = _mlp_kernel_stream_acc if use_acc else _mlp_kernel_stream_inplace
        scratch = [pltpu.VMEM((tm, OUTp), jnp.float32)] if use_acc else []
        out = pl.pallas_call(
            kernel,
            out_shape=jax.ShapeDtypeStruct((Bp, OUTp), out_dtype),
            grid_spec=pltpu.PrefetchScalarGridSpec(
                num_scalar_prefetch=0,
                grid=(grid_m, grid_k),
                in_specs=in_specs,
                out_specs=out_spec,
                scratch_shapes=scratch,
            ),
            compiler_params=pltpu.CompilerParams(
                dimension_semantics=("parallel", "arbitrary"),
                vmem_limit_bytes=vmem_limit),
            cost_estimate=cost,
        )(x, w1, w2)

    return out[:B, :OUT]


def reference(x, w1, w2):
    return jnp.maximum(x @ w1, 0.0) @ w2


if __name__ == "__main__":
    # Small deterministic shapes consistent with the module's forward:
    # batch=8 rows on this "device shard", in=16, hidden=32, out=16.
    B, IN, HID, OUT = 8, 16, 32, 16

    key = jax.random.PRNGKey(0)
    kx, k1, k2 = jax.random.split(key, 3)
    x = jax.random.normal(kx, (B, IN), dtype=jnp.float32)
    w1 = jax.random.normal(k1, (IN, HID), dtype=jnp.float32) * 0.1
    w2 = jax.random.normal(k2, (HID, OUT), dtype=jnp.float32) * 0.1

    # TODO(synk): the torch.distributed process group only affects backward
    # (gradient all-reduce); forward needs no collective, so none is emitted.

    ref = reference(x, w1, w2)

    # f32 resident-weight fast path.
    out = jax.block_until_ready(two_layer_mlp(x, w1, w2))
    assert out.shape == (B, OUT)
    assert jnp.allclose(out, ref, atol=1e-5, rtol=1e-5)

    # Ragged batch + forced multi-tile "parallel" batch grid.
    xr = jax.random.normal(kx, (13, IN), dtype=jnp.float32)
    out_r = jax.block_until_ready(two_layer_mlp(xr, w1, w2, tile_m=8))
    assert out_r.shape == (13, OUT)
    assert jnp.allclose(out_r, reference(xr, w1, w2), atol=1e-5, rtol=1e-5)

    # bf16 MXU path: weights cast ONCE ("model load"), not per call; x stays
    # f32 and is cast to bf16 inside the kernel; f32 accumulation / output.
    w1_bf, w2_bf = w1.astype(jnp.bfloat16), w2.astype(jnp.bfloat16)
    out_bf = jax.block_until_ready(two_layer_mlp(x, w1_bf, w2_bf))
    assert out_bf.shape == (B, OUT)
    assert jnp.allclose(out_bf, ref, atol=5e-2, rtol=5e-2)

    # Streamed-weight path: force tile_k < HID so the hidden axis becomes a
    # 2-step reduction grid with in-place f32 accumulation into o_ref.
    HID2 = 256
    k3, k4 = jax.random.split(k2, 2)
    w1b = jax.random.normal(k3, (IN, HID2), dtype=jnp.float32) * 0.1
    w2b = jax.random.normal(k4, (HID2, OUT), dtype=jnp.float32) * 0.1
    out_s = jax.block_until_ready(two_layer_mlp(x, w1b, w2b, tile_k=128))
    assert out_s.shape == (B, OUT)
    assert jnp.allclose(out_s, reference(x, w1b, w2b), atol=1e-4, rtol=1e-4)

    print("KERNEL_OK")
</pallas_src>

<mosaic_0001>
module attributes {stable_mosaic.version = 11 : i64} {
  func.func @_mlp_kernel_resident(%arg0: i32, %arg1: memref<8x128xf32, #tpu.memory_space<vmem>>, %arg2: memref<128x128xf32, #tpu.memory_space<vmem>>, %arg3: memref<128x128xf32, #tpu.memory_space<vmem>>, %arg4: memref<8x128xf32, #tpu.memory_space<vmem>>) attributes {dimension_semantics = [#tpu.dimension_semantics<parallel>], iteration_bounds = array<i64: 1>, scalar_prefetch = 0 : i64, scratch_operands = 0 : i64, tpu.core_type = #tpu.core_type<tc>, window_params = [{transform_indices = @transform_0, window_bounds = array<i64: 8, 128>}, {pipeline_mode = #tpu.pipeline_mode<synchronous>, transform_indices = @transform_1, window_bounds = array<i64: 128, 128>}, {pipeline_mode = #tpu.pipeline_mode<synchronous>, transform_indices = @transform_2, window_bounds = array<i64: 128, 128>}, {transform_indices = @transform_3, window_bounds = array<i64: 8, 128>}]} {
    %c0 = arith.constant 0 : index
    %c0_0 = arith.constant 0 : index
    %0 = vector.load %arg1[%c0, %c0_0] : memref<8x128xf32, #tpu.memory_space<vmem>>, vector<8x128xf32>
    %c0_1 = arith.constant 0 : index
    %c0_2 = arith.constant 0 : index
    %1 = vector.load %arg2[%c0_1, %c0_2] : memref<128x128xf32, #tpu.memory_space<vmem>>, vector<128x128xf32>
    %cst = arith.constant dense<0.000000e+00> : vector<8x128xf32>
    %2 = tpu.matmul %0, %1, %cst {dimension_numbers = #tpu.dot_dimension_numbers<[1], [0], [0], [1], [0, 0, 1, 1], [], []>} : vector<8x128xf32>, vector<128x128xf32>, vector<8x128xf32> -> vector<8x128xf32>
    %cst_3 = arith.constant 0.000000e+00 : f32
    %3 = vector.broadcast %cst_3 : f32 to vector<8x128xf32>
    %4 = arith.maximumf %2, %3 : vector<8x128xf32>
    %c0_4 = arith.constant 0 : index
    %c0_5 = arith.constant 0 : index
    %5 = vector.load %arg3[%c0_4, %c0_5] : memref<128x128xf32, #tpu.memory_space<vmem>>, vector<128x128xf32>
    %cst_6 = arith.constant dense<0.000000e+00> : vector<8x128xf32>
    %6 = tpu.matmul %4, %5, %cst_6 {dimension_numbers = #tpu.dot_dimension_numbers<[1], [0], [0], [1], [0, 0, 1, 1], [], []>} : vector<8x128xf32>, vector<128x128xf32>, vector<8x128xf32> -> vector<8x128xf32>
    %c0_7 = arith.constant 0 : index
    %c0_8 = arith.constant 0 : index
    %7 = vector.load %arg4[%c0_7, %c0_8] : memref<8x128xf32, #tpu.memory_space<vmem>>, vector<8x128xf32>
    tpu.vector_store %arg4[%c0_7, %c0_8], %6 {strides = array<i32>} : memref<8x128xf32, #tpu.memory_space<vmem>>, vector<8x128xf32>,
    return
  }
  func.func @transform_0(%arg0: i32) -> (i32, i32) {
    %c0_i32 = arith.constant 0 : i32
    %c0_i32_0 = arith.constant 0 : i32
    return %arg0, %c0_i32 : i32, i32
  }
  func.func @transform_1(%arg0: i32) -> (i32, i32) {
    %c0_i32 = arith.constant 0 : i32
    %c0_i32_0 = arith.constant 0 : i32
    %c0_i32_1 = arith.constant 0 : i32
    return %c0_i32, %c0_i32_0 : i32, i32
  }
  func.func @transform_2(%arg0: i32) -> (i32, i32) {
    %c0_i32 = arith.constant 0 : i32
    %c0_i32_0 = arith.constant 0 : i32
    %c0_i32_1 = arith.constant 0 : i32
    return %c0_i32, %c0_i32_0 : i32, i32
  }
  func.func @transform_3(%arg0: i32) -> (i32, i32) {
    %c0_i32 = arith.constant 0 : i32
    %c0_i32_0 = arith.constant 0 : i32
    return %arg0, %c0_i32 : i32, i32
  }
}

</mosaic_0001>

<bundles_post_ra>
// kernel: tpu_custom_call.1
= control target key start
LH: loop header
LB: loop body
LE: loop exit
PB: predicated region body
PF: predicated region fallthrough
CT: control target
= control target key end

     0   :  { %8 = vsyncpa [#allocation3], 0  ;;  %s599_s0 = inlined_call_operand.hbm [shape: f32[8,128], index: 0, kind: input, shape index: {}]   ;;  %s600_s1 = inlined_call_operand.hbm [shape: f32[128,128], index: 1, kind: input, shape index: {}]   ;;  %s601_s2 = inlined_call_operand.hbm [shape: f32[128,128], index: 2, kind: input, shape index: {}]   ;;  %s602_s3 = inlined_call_operand.hbm [shape: f32[8,128], index: 3, kind: output, shape index: {}]  }
   0x1   :  { %9 = vsyncpa [#allocation6], 0 }
   0x2   :  { %10 = vsyncpa [#allocation4], 0  ;;  %s500_s12 = smov [#allocation5]   ;;  %s406_s16 = scalar_lea.hbm %s600_s1, 2048 }
   0x3   :  { %s26_s13 = sshll.u32 %s500_s12, 4  ;;  %p407_p0 = scmp.ne.s32.totalorder %s600_s1, %s406_s16  ;;  %s27_s13 = int_to_ptr.vmem [resolvable:$true] %s26_s13 }
   0x4   :  { %p410_p1 = scmp.lt.u32.totalorder %s406_s16, %s600_s1 }
   0x6   :  { %p412_p2 = pnand %p410_p1, %p407_p0 }
   0x8   :  { %415 = shalt.err (!%p412_p2)
}
   0x9   :  { %s416_s21 = scalar_lea.vmem %s27_s13, 2048  ;;  %p421_p4 = scmp.lt.s32.totalorder %s27_s13, %s27_s13 }
   0xa   :  { %p417_p3 = scmp.ne.s32.totalorder %s27_s13, %s416_s21  ;;  %p422_p5 = scmp.lt.s32.totalorder %s416_s21, %s416_s21 }
   0xc   :  { %p423_p6 = por %p422_p5, %p421_p4 }
   0xe   :  { %p424_p7 = pnand %p423_p6, %p417_p3 }
  0x10   :  { %427 = shalt.err (!%p424_p7)
}
  0x11   :  { %s501_s22 = smov 128   ;;  %s502_s23 = smov 8  }
  0x12   :  { %32 = dma.hbm_to_vmem [thread:$0]  %s600_s1, 2048, %s27_s13, [#allocation6], %s501_s22, %s501_s22, %s502_s23  }
  0x13   :  { %s503_s26 = smov [#allocation2]   ;;  %s504_s28 = smov [#allocation7]  }
  0x14   :  { %s17_s27 = sshll.u32 %s503_s26, 4  ;;  %s38_s29 = sshll.u32 %s504_s28, 4  ;;  %s18_s27 = int_to_ptr.vmem [resolvable:$true] %s17_s27  ;;  %s39_s29 = int_to_ptr.vmem [resolvable:$true] %s38_s29 }
  0x15   :  { %s428_s5 = scalar_lea.hbm %s599_s0, 128 }
  0x16   :  { %p429_p8 = scmp.ne.s32.totalorder %s599_s0, %s428_s5  ;;  %p432_p9 = scmp.lt.u32.totalorder %s428_s5, %s599_s0 }
  0x18   :  { %p434_p10 = pnand %p432_p9, %p429_p8 }
  0x1a   :  { %437 = shalt.err (!%p434_p10)
}
  0x1b   :  { %s438_s1 = scalar_lea.vmem %s18_s27, 128  ;;  %p443_p12 = scmp.lt.s32.totalorder %s18_s27, %s18_s27 }
  0x1c   :  { %p439_p11 = scmp.ne.s32.totalorder %s18_s27, %s438_s1  ;;  %p444_p13 = scmp.lt.s32.totalorder %s438_s1, %s438_s1 }
  0x1e   :  { %p445_p0 = por %p444_p13, %p443_p12 }
  0x20   :  { %p446_p1 = pnand %p445_p0, %p439_p11 }
  0x22   :  { %449 = shalt.err (!%p446_p1)
}
  0x23   :  { %20 = dma.hbm_to_vmem [thread:$0]  %s599_s0, 128, %s18_s27, [#allocation3]  }
  0x24   :  { %s450_s14 = scalar_lea.hbm %s601_s2, 2048 }
  0x25   :  { %p451_p2 = scmp.ne.s32.totalorder %s601_s2, %s450_s14  ;;  %p454_p3 = scmp.lt.u32.totalorder %s450_s14, %s601_s2 }
  0x27   :  { %p456_p4 = pnand %p454_p3, %p451_p2 }
  0x29   :  { %459 = shalt.err (!%p456_p4)
}
  0x2a   :  { %s460_s19 = scalar_lea.vmem %s39_s29, 2048  ;;  %p465_p6 = scmp.lt.s32.totalorder %s39_s29, %s39_s29 }
  0x2b   :  { %p461_p5 = scmp.ne.s32.totalorder %s39_s29, %s460_s19  ;;  %p466_p7 = scmp.lt.s32.totalorder %s460_s19, %s460_s19 }
  0x2d   :  { %p467_p8 = por %p466_p7, %p465_p6 }
  0x2f   :  { %p468_p9 = pnand %p467_p8, %p461_p5 }
  0x31   :  { %471 = shalt.err (!%p468_p9)
}
  0x32   :  { %44 = dma.hbm_to_vmem [thread:$0]  %s601_s2, 2048, %s39_s29, [#allocation6], %s501_s22, %s501_s22, %s502_s23  }
  0x33   :  { %494 = dma.done.wait [#allocation3], 128  }
  0x34   :  { %495 = vsyncadd [#allocation3], 4294967168 }
  0x35   :  { %496 = dma.done.wait [#allocation6], 4096  }
  0x36   :  { %497 = vsyncadd [#allocation6], 4294963200  ;;  %v505_v0 = vmov 0.0|0.0   ;;  %vm506_vm0 = vmmov 0   ;;  %v507_v1 = vmov 0.0   ;;  %v55_v2 = vld [vmem:[#allocation5] sm:$0xff] }
  0x37   :  { %349 = vmatprep.subr.bf16.mxu0 %v505_v0  ;;  %311 = vmatprep.mubr.msk.f32.mxu0 %vm506_vm0, %v507_v1  ;;  %v56_v3 = vld [vmem:[#allocation5 + $0x8] sm:$0xff]  ;;  %v57_v4 = vld [vmem:[#allocation5 + $0x10] sm:$0xff]  ;;  %v58_v6 = vld [vmem:[#allocation5 + $0x18] sm:$0xff]  ;;  %s508_s2 = smov [#allocation8]  }
  0x38   :  { %373 = vmatprep.subr.bf16.mxu1 %v505_v0  ;;  %346 = vmatprep.mubr.msk.f32.mxu1 %vm506_vm0, %v507_v1  ;;  %v350_v5 = vpack.c.bf16 %v56_v3, %v55_v2  ;;  %v353_v7 = vpack.c.bf16 %v58_v6, %v57_v4  ;;  %v59_v8 = vld [vmem:[#allocation5 + $0x20] sm:$0xff]  ;;  %v60_v9 = vld [vmem:[#allocation5 + $0x28] sm:$0xff]  ;;  %v144_v12 = vld [vmem:[#allocation7 + $0x10] sm:$0xff]  ;;  %s235_s21 = sshll.u32 %s508_s2, 4  ;;  %s236_s21 = int_to_ptr.vmem [resolvable:$true] %s235_s21 }
  0x39   :  { %v142_v10 = vld [vmem:[#allocation7] sm:$0xff]  ;;  %v143_v11 = vld [vmem:[#allocation7 + $0x8] sm:$0xff]  ;;  %v145_v13 = vld [vmem:[#allocation7 + $0x18] sm:$0xff]  ;;  %v356_v14 = vpack.c.bf16 %v60_v9, %v59_v8  ;;  %s472_s22 = scalar_lea.vmem %s236_s21, 128  ;;  %p477_p11 = scmp.lt.s32.totalorder %s236_s21, %s236_s21 }
  0x3a   :  { %351 = vmatpush3.bf16.msra.mxu0 %v350_v5  ;;  %v374_v15 = vpack.c.bf16 %v143_v11, %v142_v10  ;;  %v61_v16 = vld [vmem:[#allocation5 + $0x30] sm:$0xff]  ;;  %v62_v17 = vld [vmem:[#allocation5 + $0x38] sm:$0xff]  ;;  %v377_v18 = vpack.c.bf16 %v145_v13, %v144_v12  ;;  %v146_v19 = vld [vmem:[#allocation7 + $0x20] sm:$0xff]  ;;  %p473_p10 = scmp.ne.s32.totalorder %s236_s21, %s472_s22  ;;  %p478_p12 = scmp.lt.s32.totalorder %s472_s22, %s472_s22 }
  0x3b   :  { %352 = vmatprep.subr.bf16.mxu0 %v505_v0  ;;  %v147_v20 = vld [vmem:[#allocation7 + $0x28] sm:$0xff]  ;;  %v359_v21 = vpack.c.bf16 %v62_v17, %v61_v16  ;;  %v63_v22 = vld [vmem:[#allocation5 + $0x40] sm:$0xff]  ;;  %v148_v25 = vld [vmem:[#allocation7 + $0x30] sm:$0xff] }
  0x3c   :  { %375 = vmatpush3.bf16.msra.mxu1 %v374_v15  ;;  %v64_v23 = vld [vmem:[#allocation5 + $0x48] sm:$0xff]  ;;  %v380_v24 = vpack.c.bf16 %v147_v20, %v146_v19  ;;  %v149_v26 = vld [vmem:[#allocation7 + $0x38] sm:$0xff]  ;;  %v65_v28 = vld [vmem:[#allocation5 + $0x50] sm:$0xff]  ;;  %p479_p13 = por %p478_p12, %p477_p11 }
  0x3d   :  { %376 = vmatprep.subr.bf16.mxu1 %v505_v0  ;;  %v362_v27 = vpack.c.bf16 %v64_v23, %v63_v22  ;;  %v66_v29 = vld [vmem:[#allocation5 + $0x58] sm:$0xff]  ;;  %v383_v30 = vpack.c.bf16 %v149_v26, %v148_v25  ;;  %v150_v31 = vld [vmem:[#allocation7 + $0x40] sm:$0xff]  ;;  %v151_v32 = vld [vmem:[#allocation7 + $0x48] sm:$0xff] }
  0x3e   :  { %354 = vmatpush3.bf16.msra.mxu0 %v353_v7  ;;  %v365_v33 = vpack.c.bf16 %v66_v29, %v65_v28  ;;  %v67_v34 = vld [vmem:[#allocation5 + $0x60] sm:$0xff]  ;;  %v68_v35 = vld [vmem:[#allocation5 + $0x68] sm:$0xff]  ;;  %v386_v36 = vpack.c.bf16 %v151_v32, %v150_v31  ;;  %v152_v37 = vld [vmem:[#allocation7 + $0x50] sm:$0xff]  ;;  %p480_p0 = pnand %p479_p13, %p473_p10 }
  0x3f   :  { %355 = vmatprep.subr.bf16.mxu0 %v505_v0  ;;  %v153_v38 = vld [vmem:[#allocation7 + $0x58] sm:$0xff]  ;;  %v368_v39 = vpack.c.bf16 %v68_v35, %v67_v34  ;;  %v69_v40 = vld [vmem:[#allocation5 + $0x70] sm:$0xff]  ;;  %v154_v43 = vld [vmem:[#allocation7 + $0x60] sm:$0xff] }
  0x40   :  { %378 = vmatpush3.bf16.msra.mxu1 %v377_v18  ;;  %v70_v41 = vld [vmem:[#allocation5 + $0x78] sm:$0xff]  ;;  %v389_v42 = vpack.c.bf16 %v153_v38, %v152_v37  ;;  %v155_v44 = vld [vmem:[#allocation7 + $0x68] sm:$0xff]  ;;  %v156_v48 = vld [vmem:[#allocation7 + $0x70] sm:$0xff] }
  0x41   :  { %379 = vmatprep.subr.bf16.mxu1 %v505_v0  ;;  %v371_v45 = vpack.c.bf16 %v70_v41, %v69_v40  ;;  %v392_v46 = vpack.c.bf16 %v155_v44, %v154_v43  ;;  %v54_v47 = vld [vmem:[#allocation2] sm:$0xff] }
  0x42   :  { %357 = vmatpush3.bf16.msra.mxu0 %v356_v14  ;;  %v157_v49 = vld [vmem:[#allocation7 + $0x78] sm:$0xff] }
  0x43   :  { %358 = vmatprep.subr.bf16.mxu0 %v505_v0  ;;  %v395_v50 = vpack.c.bf16 %v157_v49, %v156_v48 }
  0x44   :  { %381 = vmatpush3.bf16.msra.mxu1 %v380_v24 }
  0x45   :  { %382 = vmatprep.subr.bf16.mxu1 %v505_v0 }
  0x46   :  { %360 = vmatpush3.bf16.msra.mxu0 %v359_v21 }
  0x47   :  { %361 = vmatprep.subr.bf16.mxu0 %v505_v0 }
  0x48   :  { %384 = vmatpush3.bf16.msra.mxu1 %v383_v30 }
  0x49   :  { %385 = vmatprep.subr.bf16.mxu1 %v505_v0 }
  0x4a   :  { %363 = vmatpush3.bf16.msra.mxu0 %v362_v27 }
  0x4b   :  { %364 = vmatprep.subr.bf16.mxu0 %v505_v0 }
  0x4c   :  { %387 = vmatpush3.bf16.msra.mxu1 %v386_v36 }
  0x4d   :  { %388 = vmatprep.subr.bf16.mxu1 %v505_v0 }
  0x4e   :  { %366 = vmatpush3.bf16.msra.mxu0 %v365_v33 }
  0x4f   :  { %367 = vmatprep.subr.bf16.mxu0 %v505_v0 }
  0x50   :  { %390 = vmatpush3.bf16.msra.mxu1 %v389_v42 }
  0x51   :  { %391 = vmatprep.subr.bf16.mxu1 %v505_v0 }
  0x52   :  { %369 = vmatpush3.bf16.msra.mxu0 %v368_v39 }
  0x53   :  { %370 = vmatprep.subr.bf16.mxu0 %v505_v0 }
  0x54   :  { %393 = vmatpush3.bf16.msra.mxu1 %v392_v46 }
  0x55   :  { %394 = vmatprep.subr.bf16.mxu1 %v505_v0 }
  0x56   :  { %372 = vmatpush3.bf16.msra.mxu0 %v371_v45 }
  0x58   :  { %396 = vmatpush3.bf16.msra.mxu1 %v395_v50 }
  0x59   :  { %312 = vmatmul.mubr.f32.vlgmr.msra.gmra.mrb[0].mxu0 %v54_v47 }
 0x12c   :  { %v137_v51 = vpop.f32.mrb[0].mxu0 }
 0x12d   :  { %v141_v52 = vmax.f32 %v137_v51, 0.0  ;;  %v313_v53 = vpop.f32.mrb[1].mxu0 }
 0x12f   :  { %347 = vmatmul.mubr.f32.vlgmr.msra.gmra.mrb[0].mxu1 %v141_v52 }
 0x202   :  { %v224_v54 = vpop.f32.mrb[0].mxu1 }
 0x203   :  { %228 = vst [vmem:[#allocation8] sm:$0xff] %v224_v54  ;;  %v348_v55 = vpop.f32.mrb[1].mxu1 }
 0x204   :  { %483 = shalt.err (!%p480_p0)
}
 0x205   :  { %s484_s25 = scalar_lea.hbm %s602_s3, 128 }
 0x206   :  { %p485_p1 = scmp.ne.s32.totalorder %s602_s3, %s484_s25  ;;  %p488_p2 = scmp.lt.u32.totalorder %s484_s25, %s602_s3 }
 0x208   :  { %p490_p3 = pnand %p488_p2, %p485_p1 }
 0x20a   :  { %493 = shalt.err (!%p490_p3)
}
 0x20b   :  { %238 = dma.vmem_to_hbm [thread:$0]  %s236_s21, 128, %s602_s3, [#allocation4]  }
 0x20c   :  { %498 = dma.done.wait [#allocation4], 128  }
 0x20d   :  { %499 = vsyncadd [#allocation4], 4294967168 }
 0x20e   :  { %242 = vsyncpa [#allocation3], 1 }
 0x20f   :  { %243 = vsyncpa [#allocation6], 1 }
 0x210   :  { %244 = vsyncpa [#allocation4], 1 }

</bundles_post_ra>
